<compile_context>
chip_gen: v6e
topology: v6e:2x2x1
jax: 0.10.0
libtpu: 0.0.40
codegen_flags: <defaults>
</compile_context>

<pallas_src>
import jax
import jax.numpy as jnp
from jax.experimental import pallas as pl
from jax.experimental.pallas import tpu as pltpu

_MIB = 1024 * 1024


def _round_up(x, m):
    return ((x + m - 1) // m) * m


def _cdiv(a, b):
    return (a + b - 1) // b


# --------------------------------------------------------------------------- #
# Kernels
# --------------------------------------------------------------------------- #
def _skip_layer_kernel(x_ref, wt_ref, b_ref, o_ref):
    """Full-K kernel. x_ref: (tm, Dp), wt_ref: (Dp, tn), b_ref: (1, Dp), o_ref: (tm, tn)."""
    tn = o_ref.shape[1]
    Dp = x_ref.shape[1]

    # MXU matmul with f32 accumulation; the operand cast (e.g. f32 -> bf16)
    # happens here on the VPU so x is only streamed from HBM once.
    y = jax.lax.dot_general(
        x_ref[...].astype(wt_ref.dtype), wt_ref[...],
        dimension_numbers=(((1,), (0,)), ((), ())),   # [tm,K] x [K,tn] -> [tm,tn]
        preferred_element_type=jnp.float32,
    )

    if tn == Dp:
        # Single column tile (weight-stationary path): residual / bias are the
        # whole resident blocks -- no dynamic slicing at all.
        xres = x_ref[...]
        bias = b_ref[...]
    else:
        # Residual / bias columns of this output tile, sliced out of blocks that
        # are already resident in VMEM (no second HBM stream for x).
        col0 = pl.multiple_of(pl.program_id(1) * tn, 128)
        xres = x_ref[:, pl.ds(col0, tn)]
        bias = b_ref[:, pl.ds(col0, tn)]

    o_ref[...] = (y + bias.astype(jnp.float32)
                  + xres.astype(jnp.float32)).astype(o_ref.dtype)


def _skip_layer_kernel_ktiled(x_ref, wt_ref, b_ref, o_ref, acc_ref):
    """K-tiled kernel for large D.
    x_ref: (tm, tk), wt_ref: (tk, tn), b_ref: (1, tn), o_ref/acc_ref: (tm, tn)."""
    tn = o_ref.shape[1]
    tk = x_ref.shape[1]
    j = pl.program_id(1)
    k = pl.program_id(2)

    @pl.when(k == 0)
    def _init():
        acc_ref[...] = jnp.zeros_like(acc_ref)

    acc_ref[...] += jax.lax.dot_general(
        x_ref[...].astype(wt_ref.dtype), wt_ref[...],
        dimension_numbers=(((1,), (0,)), ((), ())),
        preferred_element_type=jnp.float32,
    )

    # The residual columns [j*tn, j*tn+tn) of x live in K-block (j*tn)//tk; add
    # them from the LHS block resident at that step (single x stream, f32 add).
    col0 = j * tn
    res_k = col0 // tk

    @pl.when(k == res_k)
    def _residual():
        local = pl.multiple_of(col0 - res_k * tk, 128)  # tk % tn == 0 -> 128-aligned
        acc_ref[...] += x_ref[:, pl.ds(local, tn)].astype(jnp.float32)

    @pl.when(k == pl.num_programs(2) - 1)
    def _finalize():
        o_ref[...] = (acc_ref[...] + b_ref[...].astype(jnp.float32)).astype(o_ref.dtype)


# --------------------------------------------------------------------------- #
# Wrappers
# --------------------------------------------------------------------------- #
def prepare_skip_layer_params(w, b, compute_dtype=None):
    """One-time parameter prep (do this at init, NOT per call).

    nn.Linear W [out_dim, in_dim] -> W^T [K, N], zero-padded to a multiple of
    128 and optionally cast to compute_dtype (e.g. jnp.bfloat16 for the MXU).
    Bias is padded to (1, Dp).  Zero padding keeps the math exact.
    """
    D_out, D_in = w.shape
    assert D_out == D_in, "Skip_Layer residual add requires in_dim == out_dim"
    assert b.shape == (D_out,)
    D = D_in
    Dp = _round_up(D, 128)
    wt = jnp.transpose(w)                 # [in_dim, out_dim] = [K, N]
    b2 = b.reshape(1, D)
    if Dp != D:
        wt = jnp.pad(wt, ((0, Dp - D), (0, Dp - D)))
        b2 = jnp.pad(b2, ((0, 0), (0, Dp - D)))
    if compute_dtype is not None:
        wt = wt.astype(compute_dtype)
    return wt, b2


@jax.jit
def skip_layer_apply(x, wt_p, b_p):
    """y = x @ W^T + b + x, using pre-prepared (transposed/padded/cast) params."""
    orig_shape = x.shape
    D = orig_shape[-1]
    Dp = wt_p.shape[0]
    assert wt_p.shape == (Dp, Dp) and b_p.shape == (1, Dp) and D <= Dp

    x2 = x.reshape(-1, D)
    B = x2.shape[0]

    x_sz = x2.dtype.itemsize
    w_sz = wt_p.dtype.itemsize
    o_sz = x_sz

    # ---- row tile: sublane-packing multiple and balanced against B -----------
    row_mult = max(8, 32 // x_sz)                     # 8 for f32, 16 for bf16 inputs
    tm = _round_up(_cdiv(B, max(1, _cdiv(B, 512))), row_mult)
    tm = min(tm, max(row_mult, _round_up(B, row_mult)))
    Bp = _round_up(B, tm)                             # no silently dropped rows

    # ---- VMEM-capacity-aware budgets ------------------------------------------
    try:
        vmem_cap = int(pltpu.get_tpu_info().vmem_capacity_bytes)  # 128 MiB v5e/v6e, 64 MiB v7x
    except Exception:
        vmem_cap = 64 * _MIB
    w_resident_budget = vmem_cap // 8                 # ~8 MiB v7x, ~16 MiB v5e/v6e

    weight_stationary = Dp * Dp * w_sz <= w_resident_budget
    if weight_stationary:
        tn = Dp                                       # constant W index_map: DMA'd once
        use_ktiled = False
        tk = Dp
    else:
        tn = 256 if Dp % 256 == 0 else 128
        fullk_bytes = (2 * (tm * Dp * x_sz + Dp * tn * w_sz + tm * tn * o_sz)
                       + 2 * Dp * b_p.dtype.itemsize)
        use_ktiled = fullk_bytes > 40 * _MIB          # keep off v7x's 64 MiB cliff
        tk = Dp
        if use_ktiled:
            cand = (min(Dp, 1024) // tn) * tn         # multiple of tn, divides Dp
            while cand > tn and Dp % cand != 0:
                cand -= tn
            tk = cand

    # ---- pad x (zero padding keeps the math exact; sliced off afterwards) -----
    if Bp != B or Dp != D:
        xp = jnp.pad(x2, ((0, Bp - B), (0, Dp - D)))
    else:
        xp = x2

    # ---- cost estimate / footprint-derived VMEM limit --------------------------
    if use_ktiled:
        x_reads, w_reads = Dp // tn, Bp // tm
        need = (2 * (tm * tk * x_sz + tk * tn * w_sz + tm * tn * o_sz)
                + tm * tn * 4 + 2 * tn * b_p.dtype.itemsize)
    else:
        x_reads, w_reads = 1, (1 if weight_stationary else Bp // tm)
        need = (2 * (tm * Dp * x_sz + Dp * tn * w_sz + tm * tn * o_sz)
                + 2 * Dp * b_p.dtype.itemsize)
    vmem_limit = int(max(32 * _MIB, min(need * 13 // 10, (vmem_cap * 9) // 10, 100 * _MIB)))

    cost = pl.CostEstimate(
        flops=2 * Bp * Dp * Dp,
        transcendentals=0,
        bytes_accessed=int(Bp * Dp * x_sz * x_reads + Dp * Dp * w_sz * w_reads
                           + Bp * Dp * o_sz + Dp * b_p.dtype.itemsize),
    )

    # Note: for tiny shapes the grid may be (1, 1); splitting a parallel axis
    # would engage v7x's 2nd TensorCore, but there is too little work to matter.
    if not use_ktiled:
        out = pl.pallas_call(
            _skip_layer_kernel,
            out_shape=jax.ShapeDtypeStruct((Bp, Dp), x2.dtype),
            grid_spec=pltpu.PrefetchScalarGridSpec(
                num_scalar_prefetch=0,
                grid=(Bp // tm, Dp // tn),
                in_specs=[
                    pl.BlockSpec((tm, Dp), lambda i, j: (i, 0)),   # x: LHS + residual source
                    pl.BlockSpec((Dp, tn), lambda i, j: (0, j)),   # W^T column slab
                    pl.BlockSpec((1, Dp), lambda i, j: (0, 0)),    # bias, fetched once
                ],
                out_specs=pl.BlockSpec((tm, tn), lambda i, j: (i, j)),
            ),
            compiler_params=pltpu.CompilerParams(
                dimension_semantics=("parallel", "parallel"),
                vmem_limit_bytes=vmem_limit,
            ),
            cost_estimate=cost,
        )(xp, wt_p, b_p)
    else:
        out = pl.pallas_call(
            _skip_layer_kernel_ktiled,
            out_shape=jax.ShapeDtypeStruct((Bp, Dp), x2.dtype),
            grid_spec=pltpu.PrefetchScalarGridSpec(
                num_scalar_prefetch=0,
                grid=(Bp // tm, Dp // tn, Dp // tk),               # reduction axis last
                in_specs=[
                    pl.BlockSpec((tm, tk), lambda i, j, k: (i, k)),
                    pl.BlockSpec((tk, tn), lambda i, j, k: (k, j)),
                    pl.BlockSpec((1, tn), lambda i, j, k: (0, j)),
                ],
                out_specs=pl.BlockSpec((tm, tn), lambda i, j, k: (i, j)),
                scratch_shapes=[pltpu.VMEM((tm, tn), jnp.float32)],
            ),
            compiler_params=pltpu.CompilerParams(
                dimension_semantics=("parallel", "parallel", "arbitrary"),
                vmem_limit_bytes=vmem_limit,
            ),
            cost_estimate=cost,
        )(xp, wt_p, b_p)

    return out[:B, :D].reshape(orig_shape)


def skip_layer(x, w, b, *, compute_dtype=None):
    """Convenience wrapper with nn.Linear-shaped params (W [out,in], b [out]).
    For repeated calls, call prepare_skip_layer_params() once and reuse."""
    wt_p, b_p = prepare_skip_layer_params(w, b, compute_dtype)
    return skip_layer_apply(x, wt_p, b_p)


def skip_layer_ref(x, w, b):
    return x @ w.T + b + x


if __name__ == "__main__":
    key = jax.random.PRNGKey(0)
    k_x, k_w, k_b = jax.random.split(key, 3)

    batch, hidden = 8, 32  # in_dim == out_dim == hidden

    x = jax.random.normal(k_x, (batch, hidden), dtype=jnp.float32)
    # nn.Linear-shaped params: W [out_dim, in_dim], b [out_dim]
    bound = 1.0 / (hidden ** 0.5)
    w = jax.random.uniform(k_w, (hidden, hidden), minval=-bound, maxval=bound,
                           dtype=jnp.float32)
    b = jax.random.uniform(k_b, (hidden,), minval=-bound, maxval=bound,
                           dtype=jnp.float32)

    # One-time param prep (transpose/pad) hoisted out of the per-call path.
    wt_p, b_p = prepare_skip_layer_params(w, b)

    out = skip_layer_apply(x, wt_p, b_p)
    out = jax.block_until_ready(out)

    ref = skip_layer_ref(x, w, b)
    assert out.shape == ref.shape
    assert jnp.allclose(out, ref, atol=1e-5, rtol=1e-5), "mismatch vs reference"

    print("KERNEL_OK")
</pallas_src>

<mosaic_0001>
module attributes {stable_mosaic.version = 11 : i64} {
  func.func @_skip_layer_kernel(%arg0: i32, %arg1: i32, %arg2: memref<8x128xf32, #tpu.memory_space<vmem>>, %arg3: memref<128x128xf32, #tpu.memory_space<vmem>>, %arg4: memref<1x128xf32, #tpu.memory_space<vmem>>, %arg5: memref<8x128xf32, #tpu.memory_space<vmem>>) attributes {dimension_semantics = [#tpu.dimension_semantics<parallel>, #tpu.dimension_semantics<parallel>], iteration_bounds = array<i64: 1, 1>, scalar_prefetch = 0 : i64, scratch_operands = 0 : i64, tpu.core_type = #tpu.core_type<tc>, window_params = [{transform_indices = @transform_0, window_bounds = array<i64: 8, 128>}, {transform_indices = @transform_1, window_bounds = array<i64: 128, 128>}, {pipeline_mode = #tpu.pipeline_mode<synchronous>, transform_indices = @transform_2, window_bounds = array<i64: 1, 128>}, {transform_indices = @transform_3, window_bounds = array<i64: 8, 128>}]} {
    %c0 = arith.constant 0 : index
    %c0_0 = arith.constant 0 : index
    %0 = vector.load %arg2[%c0, %c0_0] : memref<8x128xf32, #tpu.memory_space<vmem>>, vector<8x128xf32>
    %c0_1 = arith.constant 0 : index
    %c0_2 = arith.constant 0 : index
    %1 = vector.load %arg3[%c0_1, %c0_2] : memref<128x128xf32, #tpu.memory_space<vmem>>, vector<128x128xf32>
    %cst = arith.constant dense<0.000000e+00> : vector<8x128xf32>
    %2 = tpu.matmul %0, %1, %cst {dimension_numbers = #tpu.dot_dimension_numbers<[1], [0], [0], [1], [0, 0, 1, 1], [], []>} : vector<8x128xf32>, vector<128x128xf32>, vector<8x128xf32> -> vector<8x128xf32>
    %c0_3 = arith.constant 0 : index
    %c0_4 = arith.constant 0 : index
    %3 = vector.load %arg2[%c0_3, %c0_4] : memref<8x128xf32, #tpu.memory_space<vmem>>, vector<8x128xf32>
    %c0_5 = arith.constant 0 : index
    %c0_6 = arith.constant 0 : index
    %4 = vector.load %arg4[%c0_5, %c0_6] : memref<1x128xf32, #tpu.memory_space<vmem>>, vector<1x128xf32>
    %5 = vector.broadcast %4 : vector<1x128xf32> to vector<8x128xf32>
    %6 = arith.addf %2, %5 : vector<8x128xf32>
    %7 = arith.addf %6, %3 : vector<8x128xf32>
    %c0_7 = arith.constant 0 : index
    %c0_8 = arith.constant 0 : index
    %8 = vector.load %arg5[%c0_7, %c0_8] : memref<8x128xf32, #tpu.memory_space<vmem>>, vector<8x128xf32>
    tpu.vector_store %arg5[%c0_7, %c0_8], %7 {strides = array<i32>} : memref<8x128xf32, #tpu.memory_space<vmem>>, vector<8x128xf32>,
    return
  }
  func.func @transform_0(%arg0: i32, %arg1: i32) -> (i32, i32) {
    %c0_i32 = arith.constant 0 : i32
    %c0_i32_0 = arith.constant 0 : i32
    return %arg0, %c0_i32 : i32, i32
  }
  func.func @transform_1(%arg0: i32, %arg1: i32) -> (i32, i32) {
    %c0_i32 = arith.constant 0 : i32
    %c0_i32_0 = arith.constant 0 : i32
    return %c0_i32, %arg1 : i32, i32
  }
  func.func @transform_2(%arg0: i32, %arg1: i32) -> (i32, i32) {
    %c0_i32 = arith.constant 0 : i32
    %c0_i32_0 = arith.constant 0 : i32
    %c0_i32_1 = arith.constant 0 : i32
    return %c0_i32, %c0_i32_0 : i32, i32
  }
  func.func @transform_3(%arg0: i32, %arg1: i32) -> (i32, i32) {
    %c0_i32 = arith.constant 0 : i32
    return %arg0, %arg1 : i32, i32
  }
}

</mosaic_0001>

<bundles_post_ra>
// kernel: skip_layer_apply.1
= control target key start
LH: loop header
LB: loop body
LE: loop exit
PB: predicated region body
PF: predicated region fallthrough
CT: control target
= control target key end

     0   :  { %8 = vsyncpa [#allocation3], 0  ;;  %s281_s0 = inlined_call_operand.vmem [shape: f32[8,128], index: 0, kind: input, shape index: {}]   ;;  %s282_s1 = inlined_call_operand.hbm [shape: f32[128,128], index: 1, kind: input, shape index: {}]   ;;  %s283_s2 = inlined_call_operand.vmem [shape: f32[1,128], index: 2, kind: input, shape index: {}]   ;;  %s284_s3 = inlined_call_operand.hbm [shape: f32[8,128], index: 3, kind: output, shape index: {}]  }
   0x1   :  { %9 = vsyncpa [#allocation4], 0  ;;  %s243_s12 = smov [#allocation2]  }
   0x2   :  { %s17_s13 = sshll.u32 %s243_s12, 4  ;;  %s18_s13 = int_to_ptr.vmem [resolvable:$true] %s17_s13 }
   0x3   :  { %s207_s14 = scalar_lea.vmem %s18_s13, 2048  ;;  %p212_p1 = scmp.lt.s32.totalorder %s18_s13, %s18_s13 }
   0x4   :  { %p208_p0 = scmp.ne.s32.totalorder %s18_s13, %s207_s14  ;;  %p213_p2 = scmp.lt.s32.totalorder %s207_s14, %s207_s14 }
   0x6   :  { %p214_p3 = por %p213_p2, %p212_p1 }
   0x8   :  { %p215_p4 = pnand %p214_p3, %p208_p0 }
   0xa   :  { %218 = shalt.err (!%p215_p4)
}
   0xb   :  { %s244_s15 = smov 128   ;;  %s245_s16 = smov 8  }
   0xc   :  { %23 = dma.hbm_to_vmem [thread:$0]  %s282_s1, 2048, %s18_s13, [#allocation3], %s244_s15, %s244_s15, %s245_s16  }
   0xd   :  { %239 = dma.done.wait [#allocation3], 2048  }
   0xe   :  { %240 = vsyncadd [#allocation3], 4294965248  ;;  %v246_v0 = vmov 0.0   ;;  %vm247_vm0 = vmmov 0   ;;  %v45_v1 = vld [vmem:[#allocation2 + $0x78] sm:$0xff]  ;;  %v44_v2 = vld [vmem:[#allocation2 + $0x70] sm:$0xff] }
   0xf   :  { %158 = vmatprep.subr.mxu0 %v246_v0  ;;  %190 = vmatprep.mubr.msk.f32.mxu0 %vm247_vm0, %v246_v0  ;;  %v43_v3 = vld [vmem:[#allocation2 + $0x68] sm:$0xff]  ;;  %v42_v4 = vld [vmem:[#allocation2 + $0x60] sm:$0xff]  ;;  %v41_v5 = vld [vmem:[#allocation2 + $0x58] sm:$0xff]  ;;  %s248_s22 = smov [#allocation5]  }
  0x10   :  { %159 = vmatpush3.msra.mxu0 %v45_v1  ;;  %v40_v6 = vld [vmem:[#allocation2 + $0x50] sm:$0xff]  ;;  %v39_v7 = vld [vmem:[#allocation2 + $0x48] sm:$0xff]  ;;  %v38_v8 = vld [vmem:[#allocation2 + $0x40] sm:$0xff]  ;;  %s131_s23 = sshll.u32 %s248_s22, 4  ;;  %s132_s23 = int_to_ptr.vmem [resolvable:$true] %s131_s23 }
  0x11   :  { %160 = vmatprep.subr.mxu0 %v246_v0  ;;  %v37_v9 = vld [vmem:[#allocation2 + $0x38] sm:$0xff]  ;;  %v36_v10 = vld [vmem:[#allocation2 + $0x30] sm:$0xff]  ;;  %v35_v11 = vld [vmem:[#allocation2 + $0x28] sm:$0xff]  ;;  %s219_s24 = scalar_lea.vmem %s132_s23, 128  ;;  %p224_p6 = scmp.lt.s32.totalorder %s132_s23, %s132_s23 }
  0x12   :  { %161 = vmatpush3.msra.mxu0 %v44_v2  ;;  %v34_v12 = vld [vmem:[#allocation2 + $0x20] sm:$0xff]  ;;  %v33_v13 = vld [vmem:[#allocation2 + $0x18] sm:$0xff]  ;;  %v32_v14 = vld [vmem:[#allocation2 + $0x10] sm:$0xff]  ;;  %p220_p5 = scmp.ne.s32.totalorder %s132_s23, %s219_s24  ;;  %p225_p7 = scmp.lt.s32.totalorder %s219_s24, %s219_s24 }
  0x13   :  { %162 = vmatprep.subr.mxu0 %v246_v0  ;;  %v31_v15 = vld [vmem:[#allocation2 + $0x8] sm:$0xff]  ;;  %v30_v16 = vld [vmem:[#allocation2] sm:$0xff] }
  0x14   :  { %163 = vmatpush3.msra.mxu0 %v43_v3  ;;  %v29_v17 = vld [vmem:[%s281_s0] sm:$0xff]  ;;  %p226_p8 = por %p225_p7, %p224_p6 }
  0x15   :  { %164 = vmatprep.subr.mxu0 %v246_v0  ;;  %v140_v18 = vld [vmem:[%s283_s2] ss:$0 sm:$0xff] }
  0x16   :  { %165 = vmatpush3.msra.mxu0 %v42_v4  ;;  %p227_p9 = pnand %p226_p8, %p220_p5 }
  0x17   :  { %166 = vmatprep.subr.mxu0 %v246_v0 }
  0x18   :  { %167 = vmatpush3.msra.mxu0 %v41_v5 }
  0x19   :  { %168 = vmatprep.subr.mxu0 %v246_v0 }
  0x1a   :  { %169 = vmatpush3.msra.mxu0 %v40_v6 }
  0x1b   :  { %170 = vmatprep.subr.mxu0 %v246_v0 }
  0x1c   :  { %171 = vmatpush3.msra.mxu0 %v39_v7 }
  0x1d   :  { %172 = vmatprep.subr.mxu0 %v246_v0 }
  0x1e   :  { %173 = vmatpush3.msra.mxu0 %v38_v8 }
  0x1f   :  { %174 = vmatprep.subr.mxu0 %v246_v0 }
  0x20   :  { %175 = vmatpush3.msra.mxu0 %v37_v9 }
  0x21   :  { %176 = vmatprep.subr.mxu0 %v246_v0 }
  0x22   :  { %177 = vmatpush3.msra.mxu0 %v36_v10 }
  0x23   :  { %178 = vmatprep.subr.mxu0 %v246_v0 }
  0x24   :  { %179 = vmatpush3.msra.mxu0 %v35_v11 }
  0x25   :  { %180 = vmatprep.subr.mxu0 %v246_v0 }
  0x26   :  { %181 = vmatpush3.msra.mxu0 %v34_v12 }
  0x27   :  { %182 = vmatprep.subr.mxu0 %v246_v0 }
  0x28   :  { %183 = vmatpush3.msra.mxu0 %v33_v13 }
  0x29   :  { %184 = vmatprep.subr.mxu0 %v246_v0 }
  0x2a   :  { %185 = vmatpush3.msra.mxu0 %v32_v14 }
  0x2b   :  { %186 = vmatprep.subr.mxu0 %v246_v0 }
  0x2c   :  { %187 = vmatpush3.msra.mxu0 %v31_v15 }
  0x2d   :  { %188 = vmatprep.subr.mxu0 %v246_v0 }
  0x2e   :  { %189 = vmatpush3.msra.mxu0 %v30_v16 }
  0x2f   :  { %191 = vmatmul.mubr.f32.vlgmr.msra.gmra.mxu0 %v29_v17 }
  0xef   :  { %v119_v19 = vpop.f32.mrf.mxu0 }
  0xf0   :  { %v120_v20 = vadd.f32 %v140_v18, %v119_v19 }
  0xf1   :  { %v192_v21 = vpop.f32.mrf.mxu0 }
  0xf2   :  { %v123_v22 = vadd.f32 %v120_v20, %v29_v17 }
  0xf4   :  { %124 = vst [vmem:[#allocation5] sm:$0xff] %v123_v22 }
  0xf5   :  { %230 = shalt.err (!%p227_p9)
}
  0xf6   :  { %134 = dma.vmem_to_hbm [thread:$0]  %s132_s23, 128, %s284_s3, [#allocation4]  }
  0xf7   :  { %241 = dma.done.wait [#allocation4], 128  }
  0xf8   :  { %242 = vsyncadd [#allocation4], 4294967168 }
  0xf9   :  { %138 = vsyncpa [#allocation3], 1 }
  0xfa   :  { %139 = vsyncpa [#allocation4], 1 }

</bundles_post_ra>
